<compile_context>
chip_gen: v6e
topology: v6e:2x2x1
jax: 0.10.0
libtpu: 0.0.40
codegen_flags: <defaults>
</compile_context>

<pallas_src>
import functools
import numpy as np

import jax
import jax.numpy as jnp
from jax.experimental import pallas as pl
from jax.experimental.pallas import tpu as pltpu


_AMIN = 1e-10


# --------------------------------------------------------------------------
@functools.lru_cache(maxsize=None)
def _vmem_budget():
    """Per-generation VMEM sizing (v5e/v6e: 128 MiB, v7x: 64 MiB per core)."""
    phys = 64 * 1024 * 1024
    try:
        cap = int(getattr(pltpu.get_tpu_info(), "vmem_capacity_bytes", 0))
        if cap > 0:
            phys = cap
    except Exception:
        pass
    vmem_limit = max(32 * 1024 * 1024, min((phys // 4) * 3, 100 * 1024 * 1024))
    single_pass_cap = vmem_limit // 3   # input bytes; Pallas may double-buffer it
    return vmem_limit, single_pass_cap


def _pick_lanes(total):
    """Largest lane width giving a free (bitcast) 2D view; None -> ragged fallback."""
    for lanes in (1024, 512, 256, 128):
        if total % lanes == 0:
            return lanes
    return None


def _pick_block_rows(rows, lanes, min_mult, target_bytes=4 * 1024 * 1024):
    """Streaming row-block: multiple of min_mult (or full dim), >=4 grid steps,
    ~4 MiB of f32-equivalent per block."""
    if rows <= min_mult:
        return rows
    cap = max(min_mult, target_bytes // (lanes * 4))
    br = min_mult
    while br * 2 <= cap and rows >= 4 * (br * 2):
        br *= 2
    return br


def _pick_out_rows(rows, min_mult):
    """Single-pass output tile: a divisor of rows (no ragged writeback block)."""
    if rows <= 4 * min_mult:
        return rows
    for br in (1024, 512, 256, 128, 64, 32, 16, 8):
        if br % min_mult == 0 and rows % br == 0 and rows // br >= 3:
            return br
    return rows


# --------------------------------------------------------------------------
# Single-pass fused kernel: whole (rows, L) input resident in VMEM; global max
# computed once at step 0 into an SMEM scalar, output written in tiles so the
# writeback DMA overlaps compute.
def _fused_kernel(x_ref, o_ref, b_smem, *, rows, out_rows, fold_rows,
                  mult_scale, bias, amin, clamp_min):
    i = pl.program_id(0)

    @pl.when(i == 0)
    def _():
        xs = x_ref[...]
        if xs.dtype != jnp.float32:
            if rows % fold_rows == 0 and rows > fold_rows:
                # elementwise fold to one (fold_rows, L) slab before converting
                # (keeps the f32 temporary tiny for 16-bit inputs).
                xs = jnp.max(xs.reshape(rows // fold_rows, fold_rows,
                                        xs.shape[-1]), axis=0)
            xs = xs.astype(jnp.float32)
        xmax = jnp.max(xs)
        db_mult = jnp.log10(jnp.maximum(jnp.float32(amin), xmax))
        b_smem[0] = jnp.float32(bias) - jnp.float32(mult_scale) * db_mult

    if out_rows == rows:
        xt = x_ref[...]
    else:
        start = pl.multiple_of(i * out_rows, out_rows)
        xt = x_ref[pl.ds(start, out_rows), :]
    y = mult_scale * jnp.log10(jnp.maximum(xt.astype(jnp.float32),
                                           jnp.float32(amin))) + b_smem[0]
    if clamp_min is not None:
        y = jnp.maximum(y, jnp.float32(clamp_min))
    o_ref[...] = y.astype(o_ref.dtype)


# --------------------------------------------------------------------------
# Pass 1 (streaming): running elementwise max folded into a small (8|16, L) f32
# accumulator; garbage rows of the ragged final block are masked; one cross-lane
# reduce + SMEM scalar store at the last grid step.
def _global_max_kernel(x_ref, max_ref, vmax_ref, *, rows, block_rows, acc_rows,
                       ragged):
    i = pl.program_id(0)

    @pl.when(i == 0)
    def _():
        vmax_ref[...] = jnp.full(vmax_ref.shape, -jnp.inf, jnp.float32)

    x = x_ref[...]
    if ragged:
        row_ids = i * block_rows + jax.lax.broadcasted_iota(
            jnp.int32, (block_rows, 1), 0)
        x = jnp.where(row_ids < rows, x, jnp.array(-jnp.inf, x.dtype))
    if block_rows != acc_rows:
        x = jnp.max(x.reshape(block_rows // acc_rows, acc_rows, x.shape[-1]),
                    axis=0)
    vmax_ref[...] = jnp.maximum(vmax_ref[...], x.astype(jnp.float32))

    @pl.when(i == pl.num_programs(0) - 1)
    def _():
        max_ref[0, 0] = jnp.max(vmax_ref[...])


# --------------------------------------------------------------------------
# Pass 2 (streaming): fully folded elementwise transform,
#   y = mult_scale * log10(max(x, amin)) + b      [+ clamp]
# with the data-dependent `b` arriving pre-computed via SMEM.
def _apply_kernel(b_ref, x_ref, o_ref, *, mult_scale, amin, clamp_min):
    x = x_ref[...].astype(jnp.float32)
    y = mult_scale * jnp.log10(jnp.maximum(x, jnp.float32(amin))) + b_ref[0, 0]
    if clamp_min is not None:
        y = jnp.maximum(y, jnp.float32(clamp_min))
    o_ref[...] = y.astype(o_ref.dtype)


# --------------------------------------------------------------------------
def amplitude_to_db(x, *, stype='power', top_db=None, normalize=True,
                    single_pass_max_bytes=None):
    if top_db is not None and top_db < 0:
        raise ValueError('top_db must be positive value')

    multiplier = 10.0 if stype == 'power' else 20.0
    # normalize: (x/80 + 0.5)/0.5 == x/40 + 1  -> fold into scale/bias.
    scale = (1.0 / 40.0) if normalize else 1.0
    bias = 1.0 if normalize else 0.0
    mult_scale = multiplier * scale
    # max(x_db) == 0 exactly (ref = max(x)), so the top_db clamp reduces to
    # max(., -top_db), folded through the (monotone) normalization.
    clamp_min = ((-float(top_db)) * scale + bias) if top_db is not None else None

    orig_shape = x.shape
    orig_dtype = x.dtype
    total = int(np.prod(orig_shape)) if len(orig_shape) else 1

    float_out = jnp.issubdtype(orig_dtype, jnp.floating)
    final_dtype = orig_dtype if float_out else jnp.float32
    if total == 0:
        return jnp.zeros(orig_shape, final_dtype)

    # Keep f32 / bf16 inputs native end-to-end (halves HBM traffic for bf16).
    if orig_dtype in (jnp.float32, jnp.bfloat16):
        work_dtype = orig_dtype
    else:
        work_dtype = jnp.float32
    itemsize = jnp.dtype(work_dtype).itemsize
    min_mult = 8 if itemsize == 4 else 16

    vmem_limit, single_pass_cap = _vmem_budget()
    if single_pass_max_bytes is not None:
        single_pass_cap = single_pass_max_bytes

    # ---- lane-dense (rows, L) view: a free bitcast when total % 128 == 0 ----
    lanes = _pick_lanes(total)
    padded = False
    if lanes is None:
        # TODO(synk): totals not a multiple of 128 still pay one pad copy and
        #             one output slice; removable with 1D/manual DMA handling.
        lanes = 1024
        rows = -(-total // lanes)
        pad = rows * lanes - total
        x2 = jnp.pad(jnp.ravel(x).astype(work_dtype), (0, pad),
                     mode='constant', constant_values=-jnp.inf).reshape(rows, lanes)
        padded = True
    else:
        rows = total // lanes
        xw = x if x.dtype == work_dtype else x.astype(work_dtype)
        x2 = xw.reshape(rows, lanes)

    in_bytes = rows * lanes * itemsize
    single_pass_ok = in_bytes <= single_pass_cap
    if work_dtype != jnp.float32:
        # keep the fused-max f32 temporary bounded (see _fused_kernel fold)
        single_pass_ok = single_pass_ok and (rows % min_mult == 0 or rows <= 64)

    if single_pass_ok:
        # ---- single pass: 2x HBM traffic (1R + 1W), output tiled for overlap
        out_rows = _pick_out_rows(rows, min_mult)
        kern = functools.partial(
            _fused_kernel, rows=rows, out_rows=out_rows, fold_rows=min_mult,
            mult_scale=mult_scale, bias=bias, amin=_AMIN, clamp_min=clamp_min)
        y2 = pl.pallas_call(
            kern,
            out_shape=jax.ShapeDtypeStruct((rows, lanes), work_dtype),
            grid=(rows // out_rows,),
            in_specs=[pl.BlockSpec((rows, lanes), lambda i: (0, 0))],
            out_specs=pl.BlockSpec((out_rows, lanes), lambda i: (i, 0)),
            scratch_shapes=[pltpu.SMEM((1,), jnp.float32)],
            compiler_params=pltpu.CompilerParams(
                dimension_semantics=("arbitrary",),
                vmem_limit_bytes=vmem_limit),
        )(x2)
    else:
        # ---- streaming: 3x HBM traffic (2R + 1W), fully pipelined ----------
        br = _pick_block_rows(rows, lanes, min_mult)
        nblk = pl.cdiv(rows, br)
        acc_rows = min_mult if br % min_mult == 0 else br

        # TODO(synk): on v7x split this reduction across the two TensorCores.
        kern1 = functools.partial(
            _global_max_kernel, rows=rows, block_rows=br, acc_rows=acc_rows,
            ragged=(rows % br != 0))
        xmax = pl.pallas_call(
            kern1,
            out_shape=jax.ShapeDtypeStruct((1, 1), jnp.float32),
            grid=(nblk,),
            in_specs=[pl.BlockSpec((br, lanes), lambda i: (i, 0))],
            out_specs=pl.BlockSpec((1, 1), lambda i: (0, 0),
                                   memory_space=pltpu.MemorySpace.SMEM),
            scratch_shapes=[pltpu.VMEM((acc_rows, lanes), jnp.float32)],
            compiler_params=pltpu.CompilerParams(
                dimension_semantics=("arbitrary",),
                vmem_limit_bytes=vmem_limit),
        )(x2)

        # Tiny XLA scalar epilogue: fold ref value + normalization into `b`.
        db_mult = jnp.log10(jnp.maximum(jnp.float32(_AMIN), xmax))
        b_scalar = (jnp.float32(bias)
                    - jnp.float32(mult_scale) * db_mult).astype(jnp.float32)

        kern2 = functools.partial(_apply_kernel, mult_scale=mult_scale,
                                  amin=_AMIN, clamp_min=clamp_min)
        y2 = pl.pallas_call(
            kern2,
            out_shape=jax.ShapeDtypeStruct((rows, lanes), work_dtype),
            grid=(nblk,),
            in_specs=[pl.BlockSpec(memory_space=pltpu.MemorySpace.SMEM),
                      pl.BlockSpec((br, lanes), lambda i: (i, 0))],
            out_specs=pl.BlockSpec((br, lanes), lambda i: (i, 0)),
            compiler_params=pltpu.CompilerParams(
                dimension_semantics=("parallel",),
                vmem_limit_bytes=vmem_limit),
        )(b_scalar, x2)

    if padded:
        y = y2.reshape(-1)[:total].reshape(orig_shape)
    else:
        y = y2.reshape(orig_shape)        # free bitcast, no slice
    if y.dtype != final_dtype:
        y = y.astype(final_dtype)
    return y


# --------------------------------------------------------------------------
def _reference(x, *, stype='power', top_db=None, normalize=True):
    multiplier = 10.0 if stype == 'power' else 20.0
    amin = 1e-10
    ref_value = jnp.max(x)
    db_multiplier = jnp.log10(jnp.maximum(amin, ref_value))
    x_db = multiplier * jnp.log10(jnp.maximum(x, amin)) - multiplier * db_multiplier
    if top_db is not None:
        x_db = jnp.maximum(x_db, jnp.max(x_db) - top_db)
    if normalize:
        x_db = x_db / 80.0
        x_db = (x_db + 0.5) / 0.5
    return x_db


if __name__ == "__main__":
    key = jax.random.PRNGKey(0)
    k1, k2 = jax.random.split(key)

    # Power-spectrogram-like nonnegative input, (B, C, F, T) = (2, 4, 16, 16).
    x = jax.random.uniform(k1, (2, 4, 16, 16), dtype=jnp.float32,
                           minval=0.0, maxval=4.0) ** 2

    # 1) default config -> single-pass fused path (input resident in VMEM).
    y = jax.block_until_ready(amplitude_to_db(x, stype='power', top_db=None,
                                              normalize=True))
    y_ref = _reference(x, stype='power', top_db=None, normalize=True)
    np.testing.assert_allclose(np.asarray(y), np.asarray(y_ref),
                               rtol=1e-4, atol=1e-3)
    assert y.shape == x.shape and y.dtype == x.dtype

    # 2) top_db clamp, forced onto the streaming two-pass path.
    y = jax.block_until_ready(amplitude_to_db(x, stype='power', top_db=80.0,
                                              normalize=True,
                                              single_pass_max_bytes=0))
    y_ref = _reference(x, stype='power', top_db=80.0, normalize=True)
    np.testing.assert_allclose(np.asarray(y), np.asarray(y_ref),
                               rtol=1e-4, atol=1e-3)

    # 3) magnitude spectrogram, no normalization (single-pass path).
    xm = jnp.sqrt(x)
    y = jax.block_until_ready(amplitude_to_db(xm, stype='magnitude', top_db=60.0,
                                              normalize=False))
    y_ref = _reference(xm, stype='magnitude', top_db=60.0, normalize=False)
    np.testing.assert_allclose(np.asarray(y), np.asarray(y_ref),
                               rtol=1e-4, atol=1e-3)

    # 4) bf16 input kept native through the kernel. total = 3*5*16*24 = 5760 is a
    #    multiple of 128 but not 1024 -> (45, 128) view with no pad/slice copies;
    #    the forced-streaming run exercises the ragged final-block masking, the
    #    default run exercises the bf16 single-pass path.
    xb = (jax.random.uniform(k2, (3, 5, 16, 24), dtype=jnp.float32,
                             minval=0.0, maxval=4.0) ** 2).astype(jnp.bfloat16)
    y_ref = _reference(xb.astype(jnp.float32), stype='power', top_db=80.0,
                       normalize=True)
    for force in (0, None):
        y = jax.block_until_ready(
            amplitude_to_db(xb, stype='power', top_db=80.0, normalize=True,
                            single_pass_max_bytes=force))
        assert y.dtype == jnp.bfloat16 and y.shape == xb.shape
        np.testing.assert_allclose(np.asarray(y.astype(jnp.float32)),
                                   np.asarray(y_ref), rtol=3e-2, atol=3e-2)

    print("KERNEL_OK")
</pallas_src>

<mosaic_0001>
module attributes {stable_mosaic.version = 11 : i64} {
  func.func @_fused_kernel(%arg0: i32, %arg1: memref<2x1024xf32, #tpu.memory_space<vmem>>, %arg2: memref<2x1024xf32, #tpu.memory_space<vmem>>, %arg3: memref<1xf32, #tpu.memory_space<smem>>) attributes {dimension_semantics = [#tpu.dimension_semantics<arbitrary>], iteration_bounds = array<i64: 1>, scalar_prefetch = 0 : i64, scratch_operands = 1 : i64, tpu.core_type = #tpu.core_type<tc>, window_params = [{pipeline_mode = #tpu.pipeline_mode<synchronous>, transform_indices = @transform_0, window_bounds = array<i64: 2, 1024>}, {transform_indices = @transform_1, window_bounds = array<i64: 2, 1024>}]} {
    %c0_i32 = arith.constant 0 : i32
    %0 = arith.cmpi eq, %arg0, %c0_i32 : i32
    %1 = arith.extui %0 : i1 to i32
    %c0_i32_0 = arith.constant 0 : i32
    %2 = arith.cmpi ne, %1, %c0_i32_0 : i32
    scf.if %2 {
      %c0_7 = arith.constant 0 : index
      %c0_8 = arith.constant 0 : index
      %15 = vector.load %arg1[%c0_7, %c0_8] : memref<2x1024xf32, #tpu.memory_space<vmem>>, vector<2x1024xf32>
      %16 = vector.shape_cast %15 : vector<2x1024xf32> to vector<1x2x1024xf32>
      %cst_9 = arith.constant dense<0xFF800000> : vector<1xf32>
      %17 = vector.multi_reduction <maximumf>, %16, %cst_9 [1, 2] : vector<1x2x1024xf32> to vector<1xf32>
      %18 = vector.shape_cast %17 : vector<1xf32> to vector<1x1x1xf32>
      %19 = vector.extract %18[0, 0, 0] : f32 from vector<1x1x1xf32>
      %cst_10 = arith.constant 1.000000e-10 : f32
      %20 = arith.maximumf %cst_10, %19 : f32
      %21 = math.log %20 : f32
      %cst_11 = arith.constant 0.434294492 : f32
      %22 = arith.mulf %21, %cst_11 : f32
      %cst_12 = arith.constant 2.500000e-01 : f32
      %23 = arith.mulf %cst_12, %22 : f32
      %cst_13 = arith.constant 1.000000e+00 : f32
      %24 = arith.subf %cst_13, %23 : f32
      %c0_14 = arith.constant 0 : index
      %25 = memref.load %arg3[%c0_14] : memref<1xf32, #tpu.memory_space<smem>>
      memref.store %24, %arg3[%c0_14] : memref<1xf32, #tpu.memory_space<smem>>
    } else {
    }
    %c0 = arith.constant 0 : index
    %c0_1 = arith.constant 0 : index
    %3 = vector.load %arg1[%c0, %c0_1] : memref<2x1024xf32, #tpu.memory_space<vmem>>, vector<2x1024xf32>
    %cst = arith.constant 1.000000e-10 : f32
    %4 = vector.broadcast %cst : f32 to vector<2x1024xf32>
    %5 = arith.maximumf %3, %4 : vector<2x1024xf32>
    %6 = math.log %5 : vector<2x1024xf32>
    %cst_2 = arith.constant 0.434294492 : f32
    %7 = vector.broadcast %cst_2 : f32 to vector<2x1024xf32>
    %8 = arith.mulf %6, %7 : vector<2x1024xf32>
    %cst_3 = arith.constant 2.500000e-01 : f32
    %9 = vector.broadcast %cst_3 : f32 to vector<2x1024xf32>
    %10 = arith.mulf %9, %8 : vector<2x1024xf32>
    %c0_4 = arith.constant 0 : index
    %11 = memref.load %arg3[%c0_4] : memref<1xf32, #tpu.memory_space<smem>>
    %12 = vector.broadcast %11 : f32 to vector<2x1024xf32>
    %13 = arith.addf %10, %12 : vector<2x1024xf32>
    %c0_5 = arith.constant 0 : index
    %c0_6 = arith.constant 0 : index
    %14 = vector.load %arg2[%c0_5, %c0_6] : memref<2x1024xf32, #tpu.memory_space<vmem>>, vector<2x1024xf32>
    tpu.vector_store %arg2[%c0_5, %c0_6], %13 {strides = array<i32>} : memref<2x1024xf32, #tpu.memory_space<vmem>>, vector<2x1024xf32>,
    return
  }
  func.func @transform_0(%arg0: i32) -> (i32, i32) {
    %c0_i32 = arith.constant 0 : i32
    %c0_i32_0 = arith.constant 0 : i32
    %c0_i32_1 = arith.constant 0 : i32
    return %c0_i32, %c0_i32_0 : i32, i32
  }
  func.func @transform_1(%arg0: i32) -> (i32, i32) {
    %c0_i32 = arith.constant 0 : i32
    %c0_i32_0 = arith.constant 0 : i32
    return %arg0, %c0_i32 : i32, i32
  }
}

</mosaic_0001>

<bundles_post_ra>
// kernel: tpu_custom_call.1
= control target key start
LH: loop header
LB: loop body
LE: loop exit
PB: predicated region body
PF: predicated region fallthrough
CT: control target
= control target key end

     0   :  { %6 = vsyncpa [#allocation4], 0  ;;  %s227_s0 = inlined_call_operand.hbm [shape: f32[2,1024], index: 0, kind: input, shape index: {}]   ;;  %s228_s1 = inlined_call_operand.hbm [shape: f32[2,1024], index: 1, kind: output, shape index: {}]  }
   0x1   :  { %7 = vsyncpa [#allocation5], 0  ;;  %s199_s6 = smov [#allocation3]  }
   0x2   :  { %s14_s7 = sshll.u32 %s199_s6, 4  ;;  %s15_s7 = int_to_ptr.vmem [resolvable:$true] %s14_s7 }
   0x3   :  { %s163_s8 = scalar_lea.vmem %s15_s7, 256  ;;  %p168_p1 = scmp.lt.s32.totalorder %s15_s7, %s15_s7 }
   0x4   :  { %p164_p0 = scmp.ne.s32.totalorder %s15_s7, %s163_s8  ;;  %p169_p2 = scmp.lt.s32.totalorder %s163_s8, %s163_s8 }
   0x6   :  { %p170_p3 = por %p169_p2, %p168_p1 }
   0x8   :  { %p171_p4 = pnand %p170_p3, %p164_p0 }
   0xa   :  { %174 = shalt.err (!%p171_p4)
}
   0xb   :  { %17 = dma.hbm_to_vmem [thread:$0]  %s227_s0, 256, %s15_s7, [#allocation4]  }
   0xc   :  { %195 = dma.done.wait [#allocation4], 256  }
   0xd   :  { %196 = vsyncadd [#allocation4], 4294967040  ;;  %v33_v0 = vlaneseq  ;;  %v200_v1 = vmov 1983009808   ;;  %v25_v6 = vld [vmem:[#allocation3] sm:$0xff]  ;;  %v26_v7 = vld [vmem:[#allocation3 + $0x8] sm:$0xff] }
   0xe   :  { %v31_v2 = vunpack.c.l.s4 %v200_v1  ;;  %vm71_vm0 = vcmask 1041408   ;;  %v29_v8 = vcombine.high %v25_v6, %v25_v6  ;;  %v46_v10 = vcombine.high %v26_v7, %v26_v7  ;;  %s201_s11 = smov 1e-10   ;;  %s202_s17 = smov [#allocation6]  }
   0xf   :  { %v34_v3 = vshrl.u32 %v33_v0, 7  ;;  %v108_v43 = vmax.f32 %v25_v6, 1e-10  ;;  %v109_v44 = vmax.f32 %v26_v7, 1e-10  ;;  %s130_s18 = sshll.u32 %s202_s17, 4  ;;  %s131_s18 = int_to_ptr.vmem [resolvable:$true] %s130_s18 }
  0x10   :  { %v32_v4 = vunpack.c.0.s8 %v31_v2  ;;  %s175_s19 = scalar_lea.vmem %s131_s18, 256  ;;  %p180_p6 = scmp.lt.s32.totalorder %s131_s18, %s131_s18 }
  0x11   :  { %p176_p5 = scmp.ne.s32.totalorder %s131_s18, %s175_s19  ;;  %p181_p7 = scmp.lt.s32.totalorder %s175_s19, %s175_s19 }
  0x12   :  { %v35_v5 = vsub.s32 %v32_v4, %v34_v3 }
  0x13   :  { %p182_p8 = por %p181_p7, %p180_p6 }
  0x14   :  { %v36_v9 = vrot.slane %v25_v6, %v35_v5  ;;  %v53_v11 = vrot.slane %v26_v7, %v35_v5  ;;  %v43_v12 = vrot.slane %v29_v8, %v35_v5  ;;  %v60_v14 = vrot.slane %v46_v10, %v35_v5 }
  0x15   :  { %p183_p9 = pnand %p182_p8, %p176_p5 }
  0x16   :  { %v44_v13 = vcombine.high %v36_v9, %v36_v9  ;;  %v61_v15 = vcombine.high %v53_v11, %v53_v11  ;;  %v72_v16 = vsel %vm71_vm0, %v36_v9, -inf  ;;  %v76_v17 = vsel %vm71_vm0, %v53_v11, -inf }
  0x17   :  { %v45_v18 = vcombine.high %v43_v12, %v43_v12  ;;  %v62_v19 = vcombine.high %v60_v14, %v60_v14  ;;  %v74_v21 = vsel %vm71_vm0, %v43_v12, -inf  ;;  %v77_v22 = vmax.f32 %v72_v16, %v76_v17 }
  0x18   :  { %v73_v20 = vsel %vm71_vm0, %v44_v13, -inf  ;;  %v78_v23 = vsel %vm71_vm0, %v61_v15, -inf  ;;  %v80_v24 = vsel %vm71_vm0, %v60_v14, -inf }
  0x19   :  { %v75_v25 = vsel %vm71_vm0, %v45_v18, -inf  ;;  %v79_v26 = vmax.f32 %v73_v20, %v78_v23  ;;  %v81_v27 = vmax.f32 %v74_v21, %v80_v24  ;;  %v82_v28 = vsel %vm71_vm0, %v62_v19, -inf }
  0x1a   :  { %v83_v29 = vmax.f32 %v75_v25, %v82_v28 }
  0x1b   :  { %v84_v30 = vmax.f32 %v77_v22, %v79_v26 }
  0x1c   :  { %v85_v31 = vmax.f32 %v81_v27, %v83_v29 }
  0x1e   :  { %v86_v32 = vmax.f32 %v84_v30, %v85_v31 }
  0x20   :  { %87 = vmax.xlane.f32.xlu0 %v86_v32 }
  0xa9   :  { %v88_v33 = vpop.xlane.xlu0 %87 }
  0xaa   :  { %v89_v34 = vrot.slane %v88_v33, 4 }
  0xac   :  { %v90_v35 = vmax.f32 %v88_v33, %v89_v34 }
  0xae   :  { %v91_v36 = vrot.slane %v90_v35, 2 }
  0xb0   :  { %v92_v37 = vmax.f32 %v90_v35, %v91_v36 }
  0xb2   :  { %v93_v38 = vrot.slane %v92_v37, 1 }
  0xb4   :  { %v94_v39 = vmax.f32 %v92_v37, %v93_v38 }
  0xb6   :  { %139 = vpush %v94_v39 }
  0xe7   :  { %s140_s0 = spop %139 }
  0xe8   :  { %s96_s12 = smax.f32 %s201_s11, %s140_s0 }
  0xe9   :  { %v97_v40 = vstv %s96_s12 }
  0xea   :  { %149 = vlog2.f32 %v97_v40 }
  0xeb   :  { %151 = vlog2.f32 %v108_v43 }
  0xec   :  { %153 = vlog2.f32 %v109_v44 }
  0xf7   :  { %v150_v41 = vpop.eup %149 }
  0xf8   :  { %v99_v42 = vmul.f32 0.6931472, %v150_v41  ;;  %v152_v45 = vpop.eup %151 }
  0xf9   :  { %v154_v46 = vpop.eup %153  ;;  %v111_v47 = vmul.f32 0.6931472, %v152_v45 }
  0xfa   :  { %141 = vpush %v99_v42  ;;  %v113_v48 = vmul.f32 0.6931472, %v154_v46 }
  0xfb   :  { %v114_v49 = vmul.f32 0.4342945, %v111_v47 }
  0xfc   :  { %v115_v50 = vmul.f32 0.4342945, %v113_v48 }
  0xfd   :  { %v116_v51 = vmul.f32 0.25, %v114_v49 }
  0xfe   :  { %v117_v52 = vmul.f32 0.25, %v115_v50 }
 0x12b   :  { %s142_s13 = spop %141 }
 0x12c   :  { %s101_s14 = smul.f32 0.4342945, %s142_s13 }
 0x12e   :  { %s102_s15 = smul.f32 0.25, %s101_s14 }
 0x130   :  { %s103_s16 = ssub.f32 1.0, %s102_s15 }
 0x132   :  { %v119_v53 = vstv %s103_s16 }
 0x133   :  { %v120_v54 = vadd.f32 %v119_v53, %v116_v51  ;;  %v121_v55 = vadd.f32 %v119_v53, %v117_v52 }
 0x135   :  { %122 = vst [vmem:[#allocation6] sm:$0xff] %v120_v54  ;;  %123 = vst [vmem:[#allocation6 + $0x8] sm:$0xff] %v121_v55 }
 0x136   :  { %186 = shalt.err (!%p183_p9)
}
 0x137   :  { %133 = dma.vmem_to_hbm [thread:$0]  %s131_s18, 256, %s228_s1, [#allocation5]  }
 0x138   :  { %197 = dma.done.wait [#allocation5], 256  }
 0x139   :  { %198 = vsyncadd [#allocation5], 4294967040 }
 0x13a   :  { %137 = vsyncpa [#allocation4], 1 }
 0x13b   :  { %138 = vsyncpa [#allocation5], 1 }

</bundles_post_ra>
